<compile_context>
chip_gen: v7x
topology: tpu7x:2x2x1
jax: 0.10.0
libtpu: 0.0.40
codegen_flags: <defaults>
</compile_context>

<pallas_src>
import jax
import jax.numpy as jnp
import numpy as np
from jax.experimental import pallas as pl
from jax.experimental.pallas import tpu as pltpu

EPS = 1e-5
OUT_PAD = 128   # lane-dense output width (first out_dim columns are valid)


def gaze_decoder_kernel(z_ref, w1_ref, w2_ref, w3_ref, sum_ref, bcast_ref,
                        gb_ref, bias_ref, out_ref):
    """Fused Linear -> BN -> ReLU -> Linear -> BN -> ReLU -> Linear (+denorm).

    z_ref     : (Mp, L)    bf16  flattened z[:, :P, :], row i = (b=i//P, p=i%P); zero-padded rows
    w1_ref    : (L, 256)   bf16
    w2_ref    : (256, 64)  bf16
    w3_ref    : (64, 128)  bf16  w3 * screen_scale, zero-padded to 128 output lanes
    sum_ref   : (Pp, Mp)   f32   per-channel batch-averaging matrix (entries 1/B,
                                 zero columns for padded rows)
    bcast_ref : (Mp, Pp)   f32   one-hot row->channel broadcast matrix
    gb_ref    : (Mp, 8)    f32   lanes 0..3 = g1, be1, g2, be2 per row
    bias_ref  : (8, 256)   f32   row 0: b1 | row 1: b2 (lanes :64) | row 2: b3*scale (lanes :128)
    out_ref   : (Mp, 128)  f32   columns [:out_dim] hold the result
    """
    sum_mat = sum_ref[...]          # (Pp, Mp)
    bcast_mat = bcast_ref[...]      # (Mp, Pp)

    g1 = gb_ref[:, 0:1]
    be1 = gb_ref[:, 1:2]
    g2 = gb_ref[:, 2:3]
    be2 = gb_ref[:, 3:4]

    def bn_relu(h, gamma, beta):
        # BatchNorm1d(prediction_length), training mode: per-channel (= per
        # prediction step) batch stats over (batch, features), biased variance.
        # Lane-reduce per-row moments first (XLU slot), then two tiny matvecs:
        #   sum_mat   averages over the batch (entries 1/B),
        #   bcast_mat rebroadcasts the per-channel stats to every row.
        inv_f = 1.0 / h.shape[-1]
        s1 = jnp.sum(h, axis=-1, keepdims=True)                              # (Mp, 1)
        s2 = jnp.sum(h * h, axis=-1, keepdims=True)                          # (Mp, 1)
        c1 = jnp.dot(sum_mat, s1, preferred_element_type=jnp.float32)        # (Pp, 1)
        c2 = jnp.dot(sum_mat, s2, preferred_element_type=jnp.float32)        # (Pp, 1)
        mean = jnp.dot(bcast_mat, c1, preferred_element_type=jnp.float32) * inv_f
        msq = jnp.dot(bcast_mat, c2, preferred_element_type=jnp.float32) * inv_f
        var = jnp.maximum(msq - mean * mean, 0.0)                            # guard rsqrt
        hn = (h - mean) * jax.lax.rsqrt(var + EPS)
        return jnp.maximum(hn * gamma + beta, 0.0)

    # ---- Linear(latent_dim -> 256) + BN(P) + ReLU ----
    h = jnp.dot(z_ref[...], w1_ref[...], preferred_element_type=jnp.float32)
    h = h + bias_ref[0:1, :]
    h = bn_relu(h, g1, be1)

    # ---- Linear(256 -> 64) + BN(P) + ReLU ----
    h = jnp.dot(h.astype(jnp.bfloat16), w2_ref[...], preferred_element_type=jnp.float32)
    h = h + bias_ref[1:2, :64]
    h = bn_relu(h, g2, be2)

    # ---- Linear(64 -> out_dim); screen scale already folded into w3 / b3 ----
    y = jnp.dot(h.astype(jnp.bfloat16), w3_ref[...], preferred_element_type=jnp.float32)
    out_ref[...] = y + bias_ref[2:3, :out_ref.shape[-1]]


def _screen_scale(out_dim):
    s = np.ones((out_dim,), np.float32)
    if out_dim >= 1:
        s[0] = 1920.0
    if out_dim >= 2:
        s[1] = 1080.0
    return s


def _round_up(x, m):
    return (x + m - 1) // m * m


def make_gaze_decoder(params, prediction_length, batch_size):
    """Prepare all parameter-derived operands ONCE and return a jitted apply(z)."""
    P = int(prediction_length)
    B = int(batch_size)
    M = B * P
    Mp = _round_up(M, 8)
    Pp = _round_up(P, 8)
    L = params["w1"].shape[0]
    out_dim = params["w3"].shape[1]
    assert out_dim <= OUT_PAD

    scale = jnp.asarray(_screen_scale(out_dim))

    # MXU operands in bf16 (f32 accumulation inside the kernel).
    w1 = jnp.asarray(params["w1"], jnp.float32).astype(jnp.bfloat16)            # (L, 256)
    w2 = jnp.asarray(params["w2"], jnp.float32).astype(jnp.bfloat16)            # (256, 64)
    w3s = jnp.asarray(params["w3"], jnp.float32) * scale[None, :]                # fold scale
    w3p = (jnp.zeros((w3s.shape[0], OUT_PAD), jnp.float32)
           .at[:, :out_dim].set(w3s)).astype(jnp.bfloat16)                       # (64, 128)

    # O(M*P) stat matrices: per-channel batch average + row broadcast.
    ch = np.arange(M) % P
    sum_np = np.zeros((Pp, Mp), np.float32)
    sum_np[ch, np.arange(M)] = 1.0 / B
    bcast_np = np.zeros((Mp, Pp), np.float32)
    bcast_np[np.arange(M), ch] = 1.0
    sum_mat = jnp.asarray(sum_np)
    bcast_mat = jnp.asarray(bcast_np)

    # Per-row gamma/beta slab, lane-aligned starting at lane 0.
    chj = jnp.asarray(ch)
    gb = jnp.zeros((Mp, 8), jnp.float32)
    gb = gb.at[:M, 0].set(jnp.take(jnp.asarray(params["g1"], jnp.float32), chj))
    gb = gb.at[:M, 1].set(jnp.take(jnp.asarray(params["be1"], jnp.float32), chj))
    gb = gb.at[:M, 2].set(jnp.take(jnp.asarray(params["g2"], jnp.float32), chj))
    gb = gb.at[:M, 3].set(jnp.take(jnp.asarray(params["be2"], jnp.float32), chj))

    # Bias slab: b1 | b2 | b3 * scale, each in a zero-padded 256-lane row.
    bias = jnp.zeros((8, 256), jnp.float32)
    bias = bias.at[0, :].set(jnp.asarray(params["b1"], jnp.float32))
    bias = bias.at[1, :64].set(jnp.asarray(params["b2"], jnp.float32))
    bias = bias.at[2, :out_dim].set(jnp.asarray(params["b3"], jnp.float32) * scale)

    operands = (w1, w2, w3p, sum_mat, bcast_mat, gb, bias)

    flops = 2 * Mp * (L * 256 + 256 * 64 + 64 * OUT_PAD)
    bytes_accessed = int(sum(int(np.prod(o.shape)) * o.dtype.itemsize for o in operands)
                         + Mp * L * 2 + Mp * OUT_PAD * 4)
    cost = pl.CostEstimate(flops=int(flops), transcendentals=int(2 * Mp),
                           bytes_accessed=bytes_accessed)

    vmem_spec = pl.BlockSpec(memory_space=pltpu.MemorySpace.VMEM)
    call = pl.pallas_call(
        gaze_decoder_kernel,
        out_shape=jax.ShapeDtypeStruct((Mp, OUT_PAD), jnp.float32),
        in_specs=[vmem_spec] * 8,
        out_specs=vmem_spec,
        cost_estimate=cost,
    )

    @jax.jit
    def apply(z):
        zp = z[:, :P, :]                      # (B, P, L)
        z2d = zp.reshape(M, L)
        if Mp > M:
            z2d = jnp.pad(z2d, ((0, Mp - M), (0, 0)))
        z2d = z2d.astype(jnp.bfloat16)
        out2d = call(z2d, *operands)
        return out2d[:M, :out_dim].reshape(B, P, out_dim)

    return apply


def gaze_decoder_ref(z, params, prediction_length):
    """Pure-JAX f32 reference mirroring the PyTorch forward (train-mode BN)."""
    zp = z[:, :prediction_length, :]
    out_dim = params["w3"].shape[1]

    def bn_relu(h, g, b):
        mean = jnp.mean(h, axis=(0, 2), keepdims=True)
        var = jnp.mean((h - mean) ** 2, axis=(0, 2), keepdims=True)
        hn = (h - mean) / jnp.sqrt(var + EPS)
        return jnp.maximum(hn * g[None, :, None] + b[None, :, None], 0.0)

    h = jnp.einsum("bpl,lh->bph", zp, params["w1"]) + params["b1"]
    h = bn_relu(h, params["g1"], params["be1"])
    h = jnp.einsum("bph,hk->bpk", h, params["w2"]) + params["b2"]
    h = bn_relu(h, params["g2"], params["be2"])
    y = jnp.einsum("bpk,ko->bpo", h, params["w3"]) + params["b3"]
    return y * jnp.asarray(_screen_scale(out_dim))


def init_params(key, latent_dim, output_dim, prediction_length):
    """Deterministic synthetic parameters (PyTorch-Linear-style uniform init)."""
    ks = jax.random.split(key, 10)

    def lin(kw, kb, fan_in, fan_out):
        bound = 1.0 / np.sqrt(fan_in)
        w = jax.random.uniform(kw, (fan_in, fan_out), jnp.float32, -bound, bound)
        b = jax.random.uniform(kb, (fan_out,), jnp.float32, -bound, bound)
        return w, b

    w1, b1 = lin(ks[0], ks[1], latent_dim, 256)
    w2, b2 = lin(ks[2], ks[3], 256, 64)
    w3, b3 = lin(ks[4], ks[5], 64, output_dim)

    g1 = 1.0 + 0.1 * jax.random.normal(ks[6], (prediction_length,), jnp.float32)
    be1 = 0.1 * jax.random.normal(ks[7], (prediction_length,), jnp.float32)
    g2 = 1.0 + 0.1 * jax.random.normal(ks[8], (prediction_length,), jnp.float32)
    be2 = 0.1 * jax.random.normal(ks[9], (prediction_length,), jnp.float32)

    return dict(w1=w1, b1=b1, g1=g1, be1=be1, w2=w2, b2=b2, g2=g2, be2=be2,
                w3=w3, b3=b3)


if __name__ == "__main__":
    # Small shapes consistent with the module.
    B = 2                 # batch
    SEQ = 10              # input sequence length (>= prediction_length, gets sliced)
    LATENT_DIM = 32
    OUTPUT_DIM = 2        # (x, y) gaze coordinates
    PRED_LEN = 8

    key = jax.random.PRNGKey(0)
    k_z, k_p = jax.random.split(key)
    z = jax.random.normal(k_z, (B, SEQ, LATENT_DIM), jnp.float32)
    params = init_params(k_p, LATENT_DIM, OUTPUT_DIM, PRED_LEN)

    # Parameter-derived operands prepared once; per-call path is z-only.
    decoder = make_gaze_decoder(params, PRED_LEN, B)

    out = jax.block_until_ready(decoder(z))
    ref = jax.block_until_ready(gaze_decoder_ref(z, params, PRED_LEN))

    assert out.shape == (B, PRED_LEN, OUTPUT_DIM)

    # Compare in screen-normalized units (divide out the 1920/1080 denormalization)
    # so the tolerance reflects bf16-MXU precision rather than the screen scaling.
    scale = _screen_scale(OUTPUT_DIM)
    np.testing.assert_allclose(np.asarray(out) / scale, np.asarray(ref) / scale,
                               rtol=3e-2, atol=3e-2)
    print("KERNEL_OK")
</pallas_src>

<mosaic_0001>
module attributes {stable_mosaic.version = 11 : i64} {
  func.func @gaze_decoder_kernel(%arg0: memref<16x32xbf16, #tpu.memory_space<vmem>>, %arg1: memref<32x256xbf16, #tpu.memory_space<vmem>>, %arg2: memref<256x64xbf16, #tpu.memory_space<vmem>>, %arg3: memref<64x128xbf16, #tpu.memory_space<vmem>>, %arg4: memref<8x16xf32, #tpu.memory_space<vmem>>, %arg5: memref<16x8xf32, #tpu.memory_space<vmem>>, %arg6: memref<16x8xf32, #tpu.memory_space<vmem>>, %arg7: memref<8x256xf32, #tpu.memory_space<vmem>>, %arg8: memref<16x128xf32, #tpu.memory_space<vmem>>) attributes {dimension_semantics = [], scalar_prefetch = 0 : i64, scratch_operands = 0 : i64, tpu.core_type = #tpu.core_type<tc>} {
    %c0 = arith.constant 0 : index
    %c0_0 = arith.constant 0 : index
    %0 = vector.load %arg4[%c0, %c0_0] : memref<8x16xf32, #tpu.memory_space<vmem>>, vector<8x16xf32>
    %c0_1 = arith.constant 0 : index
    %c0_2 = arith.constant 0 : index
    %1 = vector.load %arg5[%c0_1, %c0_2] : memref<16x8xf32, #tpu.memory_space<vmem>>, vector<16x8xf32>
    %c0_3 = arith.constant 0 : index
    %c0_4 = arith.constant 0 : index
    %2 = vector.load %arg6[%c0_3, %c0_4] : memref<16x8xf32, #tpu.memory_space<vmem>>, vector<16x1xf32>
    %c0_5 = arith.constant 0 : index
    %c1 = arith.constant 1 : index
    %3 = vector.load %arg6[%c0_5, %c1] : memref<16x8xf32, #tpu.memory_space<vmem>>, vector<16x1xf32>
    %c0_6 = arith.constant 0 : index
    %c2 = arith.constant 2 : index
    %4 = vector.load %arg6[%c0_6, %c2] : memref<16x8xf32, #tpu.memory_space<vmem>>, vector<16x1xf32>
    %c0_7 = arith.constant 0 : index
    %c3 = arith.constant 3 : index
    %5 = vector.load %arg6[%c0_7, %c3] : memref<16x8xf32, #tpu.memory_space<vmem>>, vector<16x1xf32>
    %c0_8 = arith.constant 0 : index
    %c0_9 = arith.constant 0 : index
    %6 = vector.load %arg0[%c0_8, %c0_9] : memref<16x32xbf16, #tpu.memory_space<vmem>>, vector<16x32xbf16>
    %c0_10 = arith.constant 0 : index
    %c0_11 = arith.constant 0 : index
    %7 = vector.load %arg1[%c0_10, %c0_11] : memref<32x256xbf16, #tpu.memory_space<vmem>>, vector<32x256xbf16>
    %cst = arith.constant dense<0.000000e+00> : vector<16x256xf32>
    %8 = tpu.matmul %6, %7, %cst {dimension_numbers = #tpu.dot_dimension_numbers<[1], [0], [0], [1], [0, 0, 1, 1], [], []>} : vector<16x32xbf16>, vector<32x256xbf16>, vector<16x256xf32> -> vector<16x256xf32>
    %c0_12 = arith.constant 0 : index
    %c0_13 = arith.constant 0 : index
    %9 = vector.load %arg7[%c0_12, %c0_13] : memref<8x256xf32, #tpu.memory_space<vmem>>, vector<1x256xf32>
    %10 = vector.broadcast %9 : vector<1x256xf32> to vector<16x256xf32>
    %11 = arith.addf %8, %10 : vector<16x256xf32>
    %cst_14 = arith.constant dense<0.000000e+00> : vector<16xf32>
    %12 = vector.multi_reduction <add>, %11, %cst_14 [1] : vector<16x256xf32> to vector<16xf32>
    %13 = vector.shape_cast %12 : vector<16xf32> to vector<16x1xf32>
    %14 = arith.mulf %11, %11 : vector<16x256xf32>
    %cst_15 = arith.constant dense<0.000000e+00> : vector<16xf32>
    %15 = vector.multi_reduction <add>, %14, %cst_15 [1] : vector<16x256xf32> to vector<16xf32>
    %16 = vector.shape_cast %15 : vector<16xf32> to vector<16x1xf32>
    %cst_16 = arith.constant dense<0.000000e+00> : vector<8x1xf32>
    %17 = tpu.matmul %0, %13, %cst_16 {dimension_numbers = #tpu.dot_dimension_numbers<[1], [0], [0], [1], [0, 0, 1, 1], [], []>} : vector<8x16xf32>, vector<16x1xf32>, vector<8x1xf32> -> vector<8x1xf32>
    %cst_17 = arith.constant dense<0.000000e+00> : vector<8x1xf32>
    %18 = tpu.matmul %0, %16, %cst_17 {dimension_numbers = #tpu.dot_dimension_numbers<[1], [0], [0], [1], [0, 0, 1, 1], [], []>} : vector<8x16xf32>, vector<16x1xf32>, vector<8x1xf32> -> vector<8x1xf32>
    %cst_18 = arith.constant dense<0.000000e+00> : vector<16x1xf32>
    %19 = tpu.matmul %1, %17, %cst_18 {dimension_numbers = #tpu.dot_dimension_numbers<[1], [0], [0], [1], [0, 0, 1, 1], [], []>} : vector<16x8xf32>, vector<8x1xf32>, vector<16x1xf32> -> vector<16x1xf32>
    %cst_19 = arith.constant 3.906250e-03 : f32
    %20 = vector.broadcast %cst_19 : f32 to vector<16x1xf32>
    %21 = arith.mulf %19, %20 : vector<16x1xf32>
    %cst_20 = arith.constant dense<0.000000e+00> : vector<16x1xf32>
    %22 = tpu.matmul %1, %18, %cst_20 {dimension_numbers = #tpu.dot_dimension_numbers<[1], [0], [0], [1], [0, 0, 1, 1], [], []>} : vector<16x8xf32>, vector<8x1xf32>, vector<16x1xf32> -> vector<16x1xf32>
    %cst_21 = arith.constant 3.906250e-03 : f32
    %23 = vector.broadcast %cst_21 : f32 to vector<16x1xf32>
    %24 = arith.mulf %22, %23 : vector<16x1xf32>
    %25 = arith.mulf %21, %21 : vector<16x1xf32>
    %26 = arith.subf %24, %25 : vector<16x1xf32>
    %cst_22 = arith.constant 0.000000e+00 : f32
    %27 = vector.broadcast %cst_22 : f32 to vector<16x1xf32>
    %28 = arith.maximumf %26, %27 : vector<16x1xf32>
    %29 = vector.broadcast %21 : vector<16x1xf32> to vector<16x256xf32>
    %30 = arith.subf %11, %29 : vector<16x256xf32>
    %cst_23 = arith.constant 9.99999974E-6 : f32
    %31 = vector.broadcast %cst_23 : f32 to vector<16x1xf32>
    %32 = arith.addf %28, %31 : vector<16x1xf32>
    %33 = math.rsqrt %32 : vector<16x1xf32>
    %34 = vector.broadcast %33 : vector<16x1xf32> to vector<16x256xf32>
    %35 = arith.mulf %30, %34 : vector<16x256xf32>
    %36 = vector.broadcast %2 : vector<16x1xf32> to vector<16x256xf32>
    %37 = arith.mulf %35, %36 : vector<16x256xf32>
    %38 = vector.broadcast %3 : vector<16x1xf32> to vector<16x256xf32>
    %39 = arith.addf %37, %38 : vector<16x256xf32>
    %cst_24 = arith.constant 0.000000e+00 : f32
    %40 = vector.broadcast %cst_24 : f32 to vector<16x256xf32>
    %41 = arith.maximumf %39, %40 : vector<16x256xf32>
    %42 = arith.truncf %41 : vector<16x256xf32> to vector<16x256xbf16>
    %c0_25 = arith.constant 0 : index
    %c0_26 = arith.constant 0 : index
    %43 = vector.load %arg2[%c0_25, %c0_26] : memref<256x64xbf16, #tpu.memory_space<vmem>>, vector<256x64xbf16>
    %cst_27 = arith.constant dense<0.000000e+00> : vector<16x64xf32>
    %44 = tpu.matmul %42, %43, %cst_27 {dimension_numbers = #tpu.dot_dimension_numbers<[1], [0], [0], [1], [0, 0, 1, 1], [], []>} : vector<16x256xbf16>, vector<256x64xbf16>, vector<16x64xf32> -> vector<16x64xf32>
    %c1_28 = arith.constant 1 : index
    %c0_29 = arith.constant 0 : index
    %45 = vector.load %arg7[%c1_28, %c0_29] : memref<8x256xf32, #tpu.memory_space<vmem>>, vector<1x64xf32>
    %46 = vector.broadcast %45 : vector<1x64xf32> to vector<16x64xf32>
    %47 = arith.addf %44, %46 : vector<16x64xf32>
    %cst_30 = arith.constant dense<0.000000e+00> : vector<16xf32>
    %48 = vector.multi_reduction <add>, %47, %cst_30 [1] : vector<16x64xf32> to vector<16xf32>
    %49 = vector.shape_cast %48 : vector<16xf32> to vector<16x1xf32>
    %50 = arith.mulf %47, %47 : vector<16x64xf32>
    %cst_31 = arith.constant dense<0.000000e+00> : vector<16xf32>
    %51 = vector.multi_reduction <add>, %50, %cst_31 [1] : vector<16x64xf32> to vector<16xf32>
    %52 = vector.shape_cast %51 : vector<16xf32> to vector<16x1xf32>
    %cst_32 = arith.constant dense<0.000000e+00> : vector<8x1xf32>
    %53 = tpu.matmul %0, %49, %cst_32 {dimension_numbers = #tpu.dot_dimension_numbers<[1], [0], [0], [1], [0, 0, 1, 1], [], []>} : vector<8x16xf32>, vector<16x1xf32>, vector<8x1xf32> -> vector<8x1xf32>
    %cst_33 = arith.constant dense<0.000000e+00> : vector<8x1xf32>
    %54 = tpu.matmul %0, %52, %cst_33 {dimension_numbers = #tpu.dot_dimension_numbers<[1], [0], [0], [1], [0, 0, 1, 1], [], []>} : vector<8x16xf32>, vector<16x1xf32>, vector<8x1xf32> -> vector<8x1xf32>
    %cst_34 = arith.constant dense<0.000000e+00> : vector<16x1xf32>
    %55 = tpu.matmul %1, %53, %cst_34 {dimension_numbers = #tpu.dot_dimension_numbers<[1], [0], [0], [1], [0, 0, 1, 1], [], []>} : vector<16x8xf32>, vector<8x1xf32>, vector<16x1xf32> -> vector<16x1xf32>
    %cst_35 = arith.constant 1.562500e-02 : f32
    %56 = vector.broadcast %cst_35 : f32 to vector<16x1xf32>
    %57 = arith.mulf %55, %56 : vector<16x1xf32>
    %cst_36 = arith.constant dense<0.000000e+00> : vector<16x1xf32>
    %58 = tpu.matmul %1, %54, %cst_36 {dimension_numbers = #tpu.dot_dimension_numbers<[1], [0], [0], [1], [0, 0, 1, 1], [], []>} : vector<16x8xf32>, vector<8x1xf32>, vector<16x1xf32> -> vector<16x1xf32>
    %cst_37 = arith.constant 1.562500e-02 : f32
    %59 = vector.broadcast %cst_37 : f32 to vector<16x1xf32>
    %60 = arith.mulf %58, %59 : vector<16x1xf32>
    %61 = arith.mulf %57, %57 : vector<16x1xf32>
    %62 = arith.subf %60, %61 : vector<16x1xf32>
    %cst_38 = arith.constant 0.000000e+00 : f32
    %63 = vector.broadcast %cst_38 : f32 to vector<16x1xf32>
    %64 = arith.maximumf %62, %63 : vector<16x1xf32>
    %65 = vector.broadcast %57 : vector<16x1xf32> to vector<16x64xf32>
    %66 = arith.subf %47, %65 : vector<16x64xf32>
    %cst_39 = arith.constant 9.99999974E-6 : f32
    %67 = vector.broadcast %cst_39 : f32 to vector<16x1xf32>
    %68 = arith.addf %64, %67 : vector<16x1xf32>
    %69 = math.rsqrt %68 : vector<16x1xf32>
    %70 = vector.broadcast %69 : vector<16x1xf32> to vector<16x64xf32>
    %71 = arith.mulf %66, %70 : vector<16x64xf32>
    %72 = vector.broadcast %4 : vector<16x1xf32> to vector<16x64xf32>
    %73 = arith.mulf %71, %72 : vector<16x64xf32>
    %74 = vector.broadcast %5 : vector<16x1xf32> to vector<16x64xf32>
    %75 = arith.addf %73, %74 : vector<16x64xf32>
    %cst_40 = arith.constant 0.000000e+00 : f32
    %76 = vector.broadcast %cst_40 : f32 to vector<16x64xf32>
    %77 = arith.maximumf %75, %76 : vector<16x64xf32>
    %78 = arith.truncf %77 : vector<16x64xf32> to vector<16x64xbf16>
    %c0_41 = arith.constant 0 : index
    %c0_42 = arith.constant 0 : index
    %79 = vector.load %arg3[%c0_41, %c0_42] : memref<64x128xbf16, #tpu.memory_space<vmem>>, vector<64x128xbf16>
    %cst_43 = arith.constant dense<0.000000e+00> : vector<16x128xf32>
    %80 = tpu.matmul %78, %79, %cst_43 {dimension_numbers = #tpu.dot_dimension_numbers<[1], [0], [0], [1], [0, 0, 1, 1], [], []>} : vector<16x64xbf16>, vector<64x128xbf16>, vector<16x128xf32> -> vector<16x128xf32>
    %c2_44 = arith.constant 2 : index
    %c0_45 = arith.constant 0 : index
    %81 = vector.load %arg7[%c2_44, %c0_45] : memref<8x256xf32, #tpu.memory_space<vmem>>, vector<1x128xf32>
    %82 = vector.broadcast %81 : vector<1x128xf32> to vector<16x128xf32>
    %83 = arith.addf %80, %82 : vector<16x128xf32>
    %c0_46 = arith.constant 0 : index
    %c0_47 = arith.constant 0 : index
    %84 = vector.load %arg8[%c0_46, %c0_47] : memref<16x128xf32, #tpu.memory_space<vmem>>, vector<16x128xf32>
    tpu.vector_store %arg8[%c0_46, %c0_47], %83 {strides = array<i32>} : memref<16x128xf32, #tpu.memory_space<vmem>>, vector<16x128xf32>,
    return
  }
}

</mosaic_0001>

<bundles_post_ra>
// kernel: apply.1
= control target key start
LH: loop header
LB: loop body
LE: loop exit
PB: predicated region body
PF: predicated region fallthrough
CT: control target
= control target key end

     0   :  { %13 = vsyncpa [#allocation3], 0  ;;  %s1393_s27 = smov [#allocation2]   ;;  %s1624_s0 = inlined_call_operand.vmem [shape: bf16[16,32], index: 0, kind: input, shape index: {}]   ;;  %s1625_s1 = inlined_call_operand.vmem [shape: bf16[32,256], index: 1, kind: input, shape index: {}]   ;;  %s1626_s2 = inlined_call_operand.hbm [shape: bf16[256,64], index: 2, kind: input, shape index: {}]   ;;  %s1627_s3 = inlined_call_operand.vmem [shape: bf16[64,128], index: 3, kind: input, shape index: {}]   ;;  %s1628_s4 = inlined_call_operand.vmem [shape: f32[8,16], index: 4, kind: input, shape index: {}]   ;;  %s1629_s5 = inlined_call_operand.vmem [shape: f32[16,8], index: 5, kind: input, shape index: {}]   ;;  %s1630_s6 = inlined_call_operand.vmem [shape: f32[16,8], index: 6, kind: input, shape index: {}]   ;;  %s1631_s7 = inlined_call_operand.vmem [shape: f32[8,256], index: 7, kind: input, shape index: {}]   ;;  %s1632_s8 = inlined_call_operand.vmem [shape: f32[16,128], index: 8, kind: output, shape index: {}]  }
   0x1   :  { %s23_s28 = sshll.u32 %s1393_s27, 4  ;;  %s1369_s9 = scalar_lea.hbm %s1626_s2, 2048  ;;  %s24_s28 = int_to_ptr.vmem [resolvable:$true] %s23_s28 }
   0x2   :  { %p1370_p0 = scmp.ne.s32.totalorder %s1626_s2, %s1369_s9  ;;  %p1373_p1 = scmp.lt.u32.totalorder %s1369_s9, %s1626_s2 }
   0x4   :  { %p1375_p2 = pnand %p1373_p1, %p1370_p0 }
   0x6   :  { %1378 = shalt.err (!%p1375_p2)
}
   0x7   :  { %s1379_s14 = scalar_lea.vmem %s24_s28, 2048  ;;  %p1384_p4 = scmp.lt.s32.totalorder %s24_s28, %s24_s28 }
   0x8   :  { %p1380_p3 = scmp.ne.s32.totalorder %s24_s28, %s1379_s14  ;;  %p1385_p5 = scmp.lt.s32.totalorder %s1379_s14, %s1379_s14 }
   0xa   :  { %p1386_p6 = por %p1385_p5, %p1384_p4 }
   0xc   :  { %p1387_p7 = pnand %p1386_p6, %p1380_p3 }
   0xe   :  { %1390 = shalt.err (!%p1387_p7)
}
   0xf   :  { %s1394_s15 = smov 64   ;;  %s1395_s16 = smov 4  }
  0x10   :  { %29 = dma.hbm_to_vmem [thread:$0]  %s1626_s2, 2048, %s24_s28, [#allocation3], %s1394_s15, %s1394_s15, %s1395_s16  }
  0x11   :  { %1391 = dma.done.wait [#allocation3], 2048  }
  0x12   :  { %1392 = vsyncadd [#allocation3], 4294965248  ;;  %v1396_v0 = vmov 0   ;;  %v1334_v1 = vld [vmem:[%s1625_s1 + $0x4] ss:$8 sps:$4 sm:$0xff]   ;;  %vm92_vm0 = vcmask 261120   ;;  %v57_v6 = vlaneseq }
  0x13   :  { %128 = vmatprep.mubr.bf16.mxu0 %v1396_v0  ;;  %1323 = vset.pattern.permute.xlu1 %v1396_v0  ;;  %v1336_v2 = vld [vmem:[%s1625_s1] ss:$8 sps:$4 sm:$0xff]   ;;  %v1337_v3 = vld [vmem:[%s1625_s1 + $0x14] ss:$8 sps:$4 sm:$0xff]   ;;  %v1339_v4 = vld [vmem:[%s1625_s1 + $0x10] ss:$8 sps:$4 sm:$0xff]  }
  0x14   :  { %1322 = vset.pattern.permute.xlu0 %v1396_v0  ;;  %96 = vmatprep.subr.bf16.mxu0 %v1334_v1  ;;  %v1340_v5 = vld [vmem:[%s1624_s0] sm:$0xff]   ;;  %v58_v7 = vshrl.u32 %v57_v6, 7  ;;  %v1397_v29 = vmov 0.0|0.0   ;;  %vm1398_vm1 = vmmov 0   ;;  %v1399_v30 = vmov 0.0   ;;  %v1528_v40 = vld [vmem:[%s1629_s5 + $0x8] sm:$0xff] }
  0x15   :  { %97 = vmatpush1.bf16.msra.mxu0 %v1336_v2  ;;  %v55_v9 = vld [vmem:[%s1631_s7] ss:$8 sm:$0x3]  ;;  %1300 = vmatprep.subr.bf16.mxu1 %v1397_v29  ;;  %vm155_vm2 = vcmask 130048   ;;  %vm299_vm3 = vcmask 64512   ;;  %v1345_v1 = vld [vmem:[#allocation2 + $0x50] sm:$0xff]  }
  0x16   :  { %98 = vmatprep.subr.bf16.mxu0 %v1337_v3  ;;  %v59_v8 = vsub.s32 0, %v58_v7  ;;  %v63_v10 = vsub.s32 1, %v58_v7  ;;  %1244 = vmatprep.mubr.msk.f32.mxu1 %vm1398_vm1, %v1399_v30  ;;  %v1507_v36 = vld [vmem:[%s1628_s4] sm:$0xff]  ;;  %v1546_v59 = vld [vmem:[%s1630_s6 + $0x8] sm:$0xff]  ;;  %v1347_v6 = vld [vmem:[#allocation2 + $0x58] sm:$0xff]   ;;  %vm700_vm4 = vcmask 523264  }
  0x17   :  { %v1519_v38 = vld [vmem:[%s1629_s5] sm:$0xff]  ;;  %v1343_v62 = vld [vmem:[#allocation2 + $0x48] sm:$0xff]   ;;  %v1348_v7 = vld [vmem:[#allocation2 + $0x18] sm:$0xff]  }
  0x18   :  { %v60_v11 = vrot.slane %v55_v9, %v59_v8  ;;  %v64_v12 = vrot.slane %v55_v9, %v63_v10  ;;  %v1540_v51 = vld [vmem:[%s1630_s6] sm:$0xff]  ;;  %v1344_v63 = vld [vmem:[#allocation2 + $0x8] sm:$0xff]  }
  0x19   :  { %99 = vmatpush1.bf16.msra.mxu0 %v1339_v4  ;;  %v1341_v55 = vld [vmem:[#allocation2 + $0x40] sm:$0xff]   ;;  %v1346_v4 = vld [vmem:[#allocation2 + $0x10] sm:$0xff]  }
  0x1a   :  { %v1342_v56 = vld [vmem:[#allocation2] sm:$0xff]  }
  0x1b   :  { %v1349_v8 = vld [vmem:[#allocation2 + $0x60] sm:$0xff]  }
  0x1c   :  { %1155 = vmatmul.mubr.msk.bf16.vlgmr.msra.gmra.mrb[0].mxu0 %vm92_vm0, %v1340_v5  ;;  %v1400_v5 = vmov 1   ;;  %v1350_v10 = vld [vmem:[#allocation2 + $0x20] sm:$0xff]  }
  0x1d   :  { %1261 = vmatprep.mubr.msk.f32.mxu0 %vm299_vm3, %v1519_v38 }
  0xef   :  { %v130_v13 = vpop.f32.mrb[0].mxu0 }
  0xf0   :  { %v1481_v14 = vadd.f32 %v130_v13, %v60_v11  ;;  %v132_v15 = vpop.f32.mrb[1].mxu0  ;;  %v1352_v13 = vld [vmem:[#allocation2 + $0x28] sm:$0xff]  }
  0xf1   :  { %v1483_v16 = vadd.f32 %v132_v15, %v64_v12  ;;  %v134_v17 = vpop.f32.mrb[2].mxu0  ;;  %v1353_v15 = vld [vmem:[#allocation2 + $0x70] sm:$0xff]  }
  0xf2   :  { %v1485_v18 = vadd.f32 %v134_v17, %v60_v11  ;;  %v136_v19 = vpop.f32.mrb[3].mxu0  ;;  %v145_v20 = vmul.f32 %v1481_v14, %v1481_v14  ;;  %v1351_v11 = vld [vmem:[#allocation2 + $0x68] sm:$0xff]   ;;  %v1354_v17 = vld [vmem:[#allocation2 + $0x30] sm:$0xff]  }
  0xf3   :  { %v1489_v21 = vadd.f32 %v136_v19, %v64_v12  ;;  %v139_v22 = vadd.f32 %v1483_v16, %v1481_v14  ;;  %v146_v23 = vmul.f32 %v1483_v16, %v1483_v16  ;;  %v1355_v19 = vld [vmem:[#allocation2 + $0x78] sm:$0xff]  }
  0xf4   :  { %v147_v25 = vmul.f32 %v1485_v18, %v1485_v18 }
  0xf5   :  { %140 = vadd.xlane.f32.xlu0 %v139_v22  ;;  %v149_v24 = vadd.f32 %v146_v23, %v145_v20  ;;  %v148_v26 = vmul.f32 %v1489_v21, %v1489_v21  ;;  %v142_v27 = vadd.f32 %v1489_v21, %v1485_v18  ;;  %v1356_v20 = vld [vmem:[#allocation2 + $0x38] sm:$0xff]  }
  0xf7   :  { %150 = vadd.xlane.f32.xlu1 %v149_v24  ;;  %v152_v28 = vadd.f32 %v148_v26, %v147_v25 }
  0xf9   :  { %143 = vadd.xlane.f32.xlu0 %v142_v27 }
  0xfb   :  { %153 = vadd.xlane.f32.xlu1 %v152_v28 }
 0x182   :  { %v141_v31 = vpop.xlane.xlu0 %140 }
 0x184   :  { %v151_v32 = vpop.xlane.xlu1 %150 }
 0x186   :  { %v144_v33 = vpop.xlane.xlu0 %143 }
 0x187   :  { %v1301_v34 = vpack.c.bf16 %v144_v33, %v141_v31 }
 0x188   :  { %v154_v35 = vpop.xlane.xlu1 %153 }
 0x189   :  { %1302 = vmatpush3.bf16.msra.mxu1 %v1301_v34  ;;  %v1304_v37 = vpack.c.bf16 %v154_v35, %v151_v32 }
 0x18a   :  { %1303 = vmatprep.subr.bf16.mxu1 %v1397_v29 }
 0x18c   :  { %1245 = vmatmul.mubr.msk.f32.vlgmr.msra.gmra.mrb[0].mxu1 %vm155_vm2, %v1507_v36 }
 0x18d   :  { %1305 = vmatpush3.bf16.msra.mxu1 %v1304_v37  ;;  %1251 = vmatprep.mubr.msk.f32.mxu1 %vm1398_vm1, %v1399_v30 }
 0x190   :  { %1252 = vmatmul.mubr.msk.f32.vlgmr.msra.gmra.mrb[2].mxu1 %vm155_vm2, %v1507_v36 }
 0x191   :  { %1256 = vmatprep.mubr.msk.f32.mxu1 %vm299_vm3, %v1519_v38 }
 0x25f   :  { %v225_v39 = vpop.f32.mrb[0].mxu1 }
 0x260   :  { %v1246_v41 = vpop.f32.mrb[1].mxu1  ;;  %1254 = vmatprep.subr.mxu1 %v225_v39 }
 0x261   :  { %1255 = vmatpush3.msra.mxu1 %v225_v39 }
 0x262   :  { %1257 = vmatmul.mubr.msk.f32.vlgmr.msra.gmra.mrb[4].mxu1 %vm299_vm3, %v1528_v40  ;;  %1201 = vmatprep.subr.bf16.mxu1 %v1341_v55  ;;  %v562_v55 = vld [vmem:[%s1631_s7 + $0x1] ss:$0 sm:$0xff] }
 0x263   :  { %v295_v42 = vpop.f32.mrb[2].mxu1  ;;  %1202 = vmatpush3.bf16.msra.mxu1 %v1342_v56 }
 0x264   :  { %v1253_v43 = vpop.f32.mrb[3].mxu1  ;;  %1259 = vmatprep.subr.mxu0 %v295_v42  ;;  %1203 = vmatprep.subr.bf16.mxu1 %v1343_v62 }
 0x265   :  { %1260 = vmatpush3.msra.mxu0 %v295_v42 }
 0x266   :  { %1262 = vmatmul.mubr.msk.f32.vlgmr.msra.gmra.mrb[4].mxu0 %vm299_vm3, %v1528_v40  ;;  %1306 = vmatprep.subr.bf16.mxu0 %v1397_v29 }
 0x267   :  { %1268 = vmatprep.mubr.msk.f32.mxu0 %vm1398_vm1, %v1399_v30  ;;  %1204 = vmatpush3.bf16.msra.mxu1 %v1344_v63 }
 0x268   :  { %1205 = vmatprep.subr.bf16.mxu1 %v1345_v1 }
 0x26b   :  { %1206 = vmatpush3.bf16.msra.mxu1 %v1346_v4 }
 0x26c   :  { %1207 = vmatprep.subr.bf16.mxu1 %v1347_v6 }
 0x26f   :  { %1208 = vmatpush3.bf16.msra.mxu1 %v1348_v7 }
 0x270   :  { %1209 = vmatprep.subr.bf16.mxu1 %v1349_v8 }
 0x273   :  { %1210 = vmatpush3.bf16.msra.mxu1 %v1350_v10 }
 0x274   :  { %1211 = vmatprep.subr.bf16.mxu1 %v1351_v11 }
 0x277   :  { %1212 = vmatpush3.bf16.msra.mxu1 %v1352_v13  ;;  %v1401_v13 = vmov 2  }
 0x278   :  { %1213 = vmatprep.subr.bf16.mxu1 %v1353_v15 }
 0x27b   :  { %1214 = vmatpush3.bf16.msra.mxu1 %v1354_v17 }
 0x27c   :  { %1215 = vmatprep.subr.bf16.mxu1 %v1355_v19 }
 0x27f   :  { %1216 = vmatpush3.bf16.msra.mxu1 %v1356_v20 }
 0x335   :  { %v1258_v44 = vpop.f32.mrb[4].mxu1 }
 0x336   :  { %v382_v45 = vmul.f32 0.00390625, %v1258_v44  ;;  %v372_v46 = vpop.f32.mrb[5].mxu1 }
 0x337   :  { %v381_v47 = vmul.f32 0.00390625, %v372_v46 }
 0x338   :  { %v461_v48 = vmul.f32 %v382_v45, %v382_v45  ;;  %473 = vperm.xlu1 %1323, %v382_v45  }
 0x339   :  { %v460_v49 = vmul.f32 %v381_v47, %v381_v47  ;;  %v1263_v50 = vpop.f32.mrb[4].mxu0  ;;  %468 = vperm.xlu0 %1322, %v381_v47  }
 0x33a   :  { %v459_v52 = vmul.f32 0.00390625, %v1263_v50  ;;  %v449_v53 = vpop.f32.mrb[5].mxu0 }
 0x33b   :  { %v458_v54 = vmul.f32 0.00390625, %v449_v53 }
 0x33c   :  { %v463_v57 = vsub.f32 %v459_v52, %v461_v48  ;;  %500 = vperm.xlu1 %1323, %v1540_v51  }
 0x33d   :  { %v462_v58 = vsub.f32 %v458_v54, %v460_v49 }
 0x33e   :  { %v465_v60 = vmax.f32 %v463_v57, 0.0 }
 0x33f   :  { %v464_v61 = vmax.f32 %v462_v58, 0.0 }
 0x340   :  { %v481_v2 = vadd.f32 1e-05, %v465_v60  ;;  %505 = vperm.xlu1 %1323, %v1546_v59  }
 0x341   :  { %v480_v3 = vadd.f32 1e-05, %v464_v61 }
 0x342   :  { %1361 = vrsqrt.f32 %v481_v2 }
 0x343   :  { %1363 = vrsqrt.f32 %v480_v3 }
 0x344   :  { %1324 = vset.pattern.permute.xlu1 %v1400_v5 }
 0x345   :  { %513 = vperm.xlu1 %1324, %v1540_v51  }
 0x349   :  { %1325 = vset.pattern.permute.xlu1 %v1396_v0 }
 0x34c   :  { %v1362_v9 = vpop.eup %1361 }
 0x34d   :  { %491 = vperm.xlu1 %1325, %v1362_v9   ;;  %v1364_v12 = vpop.eup %1363 }
 0x351   :  { %486 = vperm.xlu1 %1325, %v1364_v12  }
 0x355   :  { %1326 = vset.pattern.permute.xlu1 %v1400_v5 }
 0x356   :  { %517 = vperm.xlu1 %1326, %v1546_v59  }
 0x35a   :  { %1327 = vset.pattern.permute.xlu1 %v1401_v13 }
 0x3b7   :  { %v474_v22 = vpop.permute.xlu1 %473 }
 0x3b8   :  { %v469_v26 = vpop.permute.xlu0 %468  ;;  %v478_v28 = vsub.f32 %v1485_v18, %v474_v22  ;;  %v479_v31 = vsub.f32 %v1489_v21, %v474_v22 }
 0x3b9   :  { %v476_v32 = vsub.f32 %v1481_v14, %v469_v26  ;;  %v477_v33 = vsub.f32 %v1483_v16, %v469_v26 }
 0x3bb   :  { %v501_v23 = vpop.permute.xlu1 %500 }
 0x3bf   :  { %v506_v24 = vpop.permute.xlu1 %505 }
 0x3c4   :  { %v514_v25 = vpop.permute.xlu1 %513 }
 0x3cc   :  { %v492_v27 = vpop.permute.xlu1 %491 }
 0x3cd   :  { %v496_v34 = vmul.f32 %v492_v27, %v478_v28  ;;  %v497_v35 = vmul.f32 %v492_v27, %v479_v31 }
 0x3cf   :  { %v510_v44 = vmul.f32 %v506_v24, %v496_v34  ;;  %v511_v45 = vmul.f32 %v506_v24, %v497_v35 }
 0x3d0   :  { %v487_v37 = vpop.permute.xlu1 %486 }
 0x3d1   :  { %v494_v39 = vmul.f32 %v487_v37, %v476_v32  ;;  %v495_v41 = vmul.f32 %v487_v37, %v477_v33  ;;  %v1402_v32 = vmov 3  }
 0x3d3   :  { %v508_v42 = vmul.f32 %v501_v23, %v494_v39  ;;  %v509_v43 = vmul.f32 %v501_v23, %v495_v41 }
 0x3d5   :  { %v520_v46 = vadd.f32 %v514_v25, %v508_v42  ;;  %v521_v47 = vadd.f32 %v514_v25, %v509_v43  ;;  %v518_v48 = vpop.permute.xlu1 %517  ;;  %v1358_v43 = vld [vmem:[%s1627_s3 + $0x8] sm:$0xff]  }
 0x3d6   :  { %v522_v49 = vadd.f32 %v518_v48, %v510_v44  ;;  %v523_v18 = vadd.f32 %v518_v48, %v511_v45 }
 0x3d7   :  { %v524_v50 = vmax.f32 %v520_v46, 0.0  ;;  %v525_v21 = vmax.f32 %v521_v47, 0.0 }
 0x3d8   :  { %v526_v52 = vmax.f32 %v522_v49, 0.0  ;;  %v527_v14 = vmax.f32 %v523_v18, 0.0 }
 0x3da   :  { %v528_v53 = vpack.c.bf16 %v526_v52, %v524_v50  ;;  %v529_v16 = vpack.c.bf16 %v527_v14, %v525_v21 }
 0x3dc   :  { %691 = vmatprep.mubr.bf16.mxu1 %v529_v16 }
 0x3dd   :  { %692 = vmatmul.mubr.bf16.vlgmr.msra.gmra.mrb[8].mxu1 %v528_v53 }
 0x4b0   :  { %v1217_v54 = vpop.f32.mrb[8].mxu1 }
 0x4b1   :  { %v1218_v56 = vpop.f32.mrb[9].mxu1 }
 0x4b2   :  { %v1219_v57 = vadd.f32 %v1218_v56, %v1217_v54  ;;  %v1220_v58 = vpop.f32.mrb[10].mxu1 }
 0x4b3   :  { %v1221_v60 = vpop.f32.mrb[11].mxu1 }
 0x4b4   :  { %v1559_v61 = vadd.f32 %v1219_v57, %v562_v55  ;;  %v1222_v62 = vadd.f32 %v1221_v60, %v1220_v58  ;;  %v1074_v58 = vld [vmem:[%s1631_s7 + $0x2] ss:$0 sm:$0xff] }
 0x4b6   :  { %v1561_v63 = vadd.f32 %v1222_v62, %v562_v55  ;;  %v701_v1 = vsel %vm700_vm4, %v1559_v61, 0.0  ;;  %v707_v4 = vmul.f32 %v1559_v61, %v1559_v61 }
 0x4b7   :  { %702 = vadd.xlane.f32.xlu1 %v701_v1 }
 0x4b8   :  { %v704_v2 = vsel %vm700_vm4, %v1561_v63, 0.0  ;;  %v708_v3 = vmul.f32 %v1561_v63, %v1561_v63  ;;  %v709_v6 = vsel %vm700_vm4, %v707_v4, 0.0 }
 0x4b9   :  { %705 = vadd.xlane.f32.xlu0 %v704_v2 }
 0x4ba   :  { %v712_v5 = vsel %vm700_vm4, %v708_v3, 0.0 }
 0x4bb   :  { %713 = vadd.xlane.f32.xlu1 %v712_v5 }
 0x4bd   :  { %710 = vadd.xlane.f32.xlu0 %v709_v6 }
 0x4cc   :  { %1044 = vperm.xlu1 %1327, %v1540_v51  }
 0x4d0   :  { %1328 = vset.pattern.permute.xlu1 %v1396_v0 }
 0x544   :  { %v703_v7 = vpop.xlane.xlu1 %702 }
 0x546   :  { %v706_v8 = vpop.xlane.xlu0 %705 }
 0x547   :  { %v1307_v9 = vpack.c.bf16 %v706_v8, %v703_v7 }
 0x548   :  { %v714_v10 = vpop.xlane.xlu1 %713 }
 0x549   :  { %1308 = vmatpush3.bf16.msra.mxu0 %v1307_v9 }
 0x54a   :  { %v711_v11 = vpop.xlane.xlu0 %710  ;;  %1309 = vmatprep.subr.bf16.mxu0 %v1397_v29 }
 0x54b   :  { %v1310_v12 = vpack.c.bf16 %v714_v10, %v711_v11 }
 0x54c   :  { %1269 = vmatmul.mubr.msk.f32.vlgmr.msra.gmra.mrb[6].mxu0 %vm155_vm2, %v1507_v36  ;;  %v1045_v44 = vpop.permute.xlu1 %1044 }
 0x54d   :  { %1311 = vmatpush3.bf16.msra.mxu0 %v1310_v12  ;;  %1275 = vmatprep.mubr.msk.f32.mxu0 %vm1398_vm1, %v1399_v30 }
 0x550   :  { %1276 = vmatmul.mubr.msk.f32.vlgmr.msra.gmra.mrb[8].mxu0 %vm155_vm2, %v1507_v36 }
 0x551   :  { %1280 = vmatprep.mubr.msk.f32.mxu0 %vm299_vm3, %v1519_v38 }
 0x61f   :  { %v781_v29 = vpop.f32.mrb[6].mxu0 }
 0x620   :  { %1278 = vmatprep.subr.mxu0 %v781_v29  ;;  %v1270_v15 = vpop.f32.mrb[7].mxu0 }
 0x621   :  { %1279 = vmatpush3.msra.mxu0 %v781_v29 }
 0x622   :  { %1281 = vmatmul.mubr.msk.f32.vlgmr.msra.gmra.mrb[10].mxu0 %vm299_vm3, %v1528_v40 }
 0x623   :  { %v851_v17 = vpop.f32.mrb[8].mxu0  ;;  %1285 = vmatprep.mubr.msk.f32.mxu0 %vm299_vm3, %v1519_v38 }
 0x624   :  { %1283 = vmatprep.subr.mxu0 %v851_v17  ;;  %v1277_v36 = vpop.f32.mrb[9].mxu0 }
 0x625   :  { %1284 = vmatpush3.msra.mxu0 %v851_v17 }
 0x626   :  { %1286 = vmatmul.mubr.msk.f32.vlgmr.msra.gmra.mrb[12].mxu0 %vm299_vm3, %v1528_v40  ;;  %1288 = vmatprep.subr.bf16.mxu0 %v1399_v30  ;;  %v1357_v40 = vld [vmem:[%s1627_s3] sm:$0xff]  }
 0x627   :  { %1296 = vmatprep.mubr.msk.bf16.mxu0 %vm1398_vm1, %v1399_v30  ;;  %1289 = vmatpush3.bf16.msra.mxu0 %v1357_v40 }
 0x628   :  { %1290 = vmatprep.subr.bf16.mxu0 %v1399_v30 }
 0x62b   :  { %1291 = vmatpush3.bf16.msra.mxu0 %v1358_v43 }
 0x62c   :  { %1292 = vmatprep.subr.bf16.mxu0 %v1399_v30 }
 0x6f5   :  { %v1282_v19 = vpop.f32.mrb[10].mxu0 }
 0x6f6   :  { %v931_v20 = vmul.f32 0.015625, %v1282_v19  ;;  %v921_v22 = vpop.f32.mrb[11].mxu0 }
 0x6f7   :  { %v930_v23 = vmul.f32 0.015625, %v921_v22 }
 0x6f8   :  { %1022 = vperm.xlu1 %1328, %v931_v20   ;;  %v1010_v25 = vmul.f32 %v931_v20, %v931_v20 }
 0x6f9   :  { %v1287_v24 = vpop.f32.mrb[12].mxu0  ;;  %1017 = vperm.xlu0 %1322, %v930_v23   ;;  %v1009_v27 = vmul.f32 %v930_v23, %v930_v23 }
 0x6fa   :  { %v1008_v38 = vmul.f32 0.015625, %v1287_v24  ;;  %v998_v26 = vpop.f32.mrb[13].mxu0 }
 0x6fb   :  { %v1007_v28 = vmul.f32 0.015625, %v998_v26 }
 0x6fc   :  { %v1012_v31 = vsub.f32 %v1008_v38, %v1010_v25  ;;  %1330 = vset.pattern.permute.xlu1 %v1402_v32 }
 0x6fd   :  { %v1011_v33 = vsub.f32 %v1007_v28, %v1009_v27  ;;  %1054 = vperm.xlu1 %1330, %v1540_v51   ;;  %v1359_v51 = vld [vmem:[%s1627_s3 + $0x10] sm:$0xff]  }
 0x6fe   :  { %v1014_v34 = vmax.f32 %v1012_v31, 0.0  ;;  %1293 = vmatpush3.bf16.msra.mxu0 %v1359_v51 }
 0x6ff   :  { %v1013_v35 = vmax.f32 %v1011_v33, 0.0  ;;  %1294 = vmatprep.subr.bf16.mxu0 %v1399_v30 }
 0x700   :  { %v1028_v37 = vadd.f32 1e-05, %v1014_v34 }
 0x701   :  { %v1027_v39 = vadd.f32 1e-05, %v1013_v35  ;;  %1331 = vset.pattern.permute.xlu1 %v1396_v0  ;;  %v1360_v0 = vld [vmem:[%s1627_s3 + $0x18] sm:$0xff]  }
 0x702   :  { %1365 = vrsqrt.f32 %v1028_v37  ;;  %1295 = vmatpush3.bf16.msra.mxu0 %v1360_v0 }
 0x703   :  { %1367 = vrsqrt.f32 %v1027_v39 }
 0x70c   :  { %v1366_v41 = vpop.eup %1365 }
 0x70d   :  { %v1368_v42 = vpop.eup %1367  ;;  %1038 = vperm.xlu0 %1322, %v1366_v41  }
 0x70e   :  { %1033 = vperm.xlu1 %1331, %v1368_v42  }
 0x711   :  { %1329 = vset.pattern.permute.xlu0 %v1401_v13 }
 0x712   :  { %1048 = vperm.xlu0 %1329, %v1546_v59   ;;  %1332 = vset.pattern.permute.xlu1 %v1402_v32 }
 0x713   :  { %1058 = vperm.xlu1 %1332, %v1546_v59  }
 0x716   :  { %1333 = vset.pattern.permute.xlu0 %v1402_v32 }
 0x777   :  { %v1023_v45 = vpop.permute.xlu1 %1022 }
 0x778   :  { %v1018_v47 = vpop.permute.xlu0 %1017  ;;  %v1026_v50 = vsub.f32 %v1561_v63, %v1023_v45 }
 0x779   :  { %v1025_v48 = vsub.f32 %v1559_v61, %v1018_v47 }
 0x77c   :  { %v1055_v46 = vpop.permute.xlu1 %1054 }
 0x78c   :  { %v1039_v49 = vpop.permute.xlu0 %1038 }
 0x78d   :  { %v1034_v18 = vpop.permute.xlu1 %1033  ;;  %v1042_v21 = vmul.f32 %v1039_v49, %v1026_v50 }
 0x78e   :  { %v1041_v59 = vmul.f32 %v1034_v18, %v1025_v48 }
 0x790   :  { %v1051_v52 = vmul.f32 %v1045_v44, %v1041_v59 }
 0x791   :  { %v1049_v30 = vpop.permute.xlu0 %1048 }
 0x792   :  { %v1061_v14 = vadd.f32 %v1055_v46, %v1051_v52  ;;  %v1052_v53 = vmul.f32 %v1049_v30, %v1042_v21  ;;  %v1059_v16 = vpop.permute.xlu1 %1058 }
 0x794   :  { %v1062_v54 = vadd.f32 %v1059_v16, %v1052_v53  ;;  %v1063_v55 = vmax.f32 %v1061_v14, 0.0 }
 0x796   :  { %v1064_v56 = vmax.f32 %v1062_v54, 0.0 }
 0x798   :  { %v1065_v57 = vpack.c.bf16 %v1064_v56, %v1063_v55 }
 0x79a   :  { %1297 = vmatmul.mubr.msk.bf16.vlgmr.msra.gmra.mrb[16].mxu0 %vm700_vm4, %v1065_v57 }
 0x86d   :  { %v1136_v60 = vpop.f32.mrb[16].mxu0 }
 0x86e   :  { %v1137_v61 = vadd.f32 %v1136_v60, %v1074_v58  ;;  %v1298_v62 = vpop.f32.mrb[17].mxu0 }
 0x86f   :  { %v1139_v63 = vpop.f32.mrb[18].mxu0 }
 0x870   :  { %1143 = vst [vmem:[%s1632_s8] sm:$0xff] %v1137_v61  ;;  %v1140_v1 = vadd.f32 %v1139_v63, %v1074_v58  ;;  %v1299_v2 = vpop.f32.mrb[19].mxu0 }
 0x872   :  { %1144 = vst [vmem:[%s1632_s8 + $0x8] sm:$0xff] %v1140_v1 }
 0x873   :  { %1149 = vsyncpa [#allocation3], 1 }

</bundles_post_ra>
